<compile_context>
chip_gen: v5e
topology: v5e:2x2
jax: 0.10.0
libtpu: 0.0.40
codegen_flags: <defaults>
</compile_context>

<pallas_src>
import functools

import jax
import jax.numpy as jnp
from jax import lax
from jax.experimental import pallas as pl
from jax.experimental.pallas import tpu as pltpu

# ---- small synthetic shapes consistent with the module's forward ----
N_NODES = 16      # nodes in one layout graph batch
N_EDGES = 32      # aggregated edges
POS_DIM = 2       # layout.pos        : [N, 2]
ATTR_DIM = 3      # layout.aggr_attr  : [E, 3]  (aggr_weight appended -> 4)
HID = 32          # discriminator hidden width
N_GRAPHS = 2      # graphs per layout batch (values taken by layout.batch)
N_SAMPLES = 4     # independent layout samples fused into one kernel step

FEAT_W = 4        # float-slab width: max(ATTR_DIM + 1, POS_DIM), zero padded
IDX_W = 8         # int-slab lane width (only cols 0/1 carry data)
OUT_LANES = 128   # lane-dense score row, written once per call
assert ATTR_DIM + 1 <= FEAT_W and POS_DIM <= FEAT_W

# ---- param slab row offsets (8-row aligned -> all in-kernel slices aligned) ----
_W1PS = 0                                   # w1 rows for src position  [POS_DIM, H]
_W1PD = _W1PS + 8                           # w1 rows for dst position  [POS_DIM, H]
_W1AW = _W1PD + 8                           # w1 rows for attr+weight   [ATTR+1, H]
_B1   = _W1AW + 8                           # b1                        [1, H]
_W2P  = _B1 + 8                             # w2 (pos part)             [POS_DIM, H]
_W2M  = _W2P + 8                            # w2 (message part)         [H, H]
_B2   = _W2M + ((HID + 7) // 8) * 8         # b2                        [1, H]
_W3   = _B2 + 8                             # w3 transposed             [1, H]
_B3   = _W3 + 8                             # b3 scalar at [., 0]
W_ROWS = _B3 + 8


def discriminator_kernel(idx_ref, data_ref, w_ref, out_ref, *, S, E, N, B, OUT_W):
    """All S layout samples in one step.

    idx_ref  : [S*E + S*N, IDX_W] int32
               rows 0:S*E   -> col 0 = s*N + src, col 1 = s*N + dst
               rows S*E:    -> col 0 = s*B + batch
    data_ref : [S*E + S*N, FEAT_W] f32
               rows 0:S*E   -> [attr | weight]; rows S*E: -> [pos | 0]
    w_ref    : [W_ROWS, H] f32  packed, 8-row aligned parameter slab (resident)
    out_ref  : [1, OUT_W] f32   lane-dense score row; lanes 0:S*B are real
    """
    f32 = jnp.float32
    SE, SN = S * E, S * N
    Fw = data_ref.shape[1]
    H = w_ref.shape[1]

    # ---- parameters: static aligned slices of the resident slab (no copies) ----
    w1ps = w_ref[_W1PS:_W1PS + Fw, :]        # [Fw, H] (rows >= POS_DIM are zero)
    w1pd = w_ref[_W1PD:_W1PD + Fw, :]
    w1aw = w_ref[_W1AW:_W1AW + Fw, :]        # attr rows + aggr_weight row
    b1   = w_ref[_B1:_B1 + 1, :]             # [1, H]
    w2p  = w_ref[_W2P:_W2P + Fw, :]
    w2m  = w_ref[_W2M:_W2M + H, :]           # [H, H]
    b2   = w_ref[_B2:_B2 + 1, :]
    w3r  = w_ref[_W3:_W3 + 1, :]             # [1, H]  (w3 transposed)
    b3   = w_ref[_B3:_B3 + 1, 0:1]           # [1, 1]

    # ---- fused per-call data (all samples stacked along sublanes) ----
    edge_feat = data_ref[0:SE, :]            # [S*E, Fw] = [attr | weight]
    pos       = data_ref[SE:SE + SN, :]      # [S*N, Fw] (zero-padded columns)
    src_c     = idx_ref[0:SE, 0:1]           # [S*E, 1]   values in [0, S*N)
    dst_c     = idx_ref[0:SE, 1:2]           # [S*E, 1]
    batch_c   = idx_ref[SE:SE + SN, 0:1]     # [S*N, 1]   values in [0, S*B)

    # ---- block-diagonal one-hots over all samples (exact f32 0/1) ----
    lane_sn = lax.broadcasted_iota(jnp.int32, (SE, SN), 1)
    src_oh = (lane_sn == src_c).astype(f32)  # [S*E, S*N]
    dst_oh = (lane_sn == dst_c).astype(f32)  # [S*E, S*N] (reused for the scatter)

    # ---- fold pos through the split W1 position blocks (no scratch round-trip) ----
    a_pos = jnp.dot(pos, w1ps, preferred_element_type=f32)   # [S*N, H]
    b_pos = jnp.dot(pos, w1pd, preferred_element_type=f32)   # [S*N, H]

    # edge MLP: relu(pos_src@W1s + pos_dst@W1d + [attr|w]@W1aw + b1)
    h_e = jnp.maximum(
        jnp.dot(src_oh, a_pos, preferred_element_type=f32)
        + jnp.dot(dst_oh, b_pos, preferred_element_type=f32)
        + jnp.dot(edge_feat, w1aw, preferred_element_type=f32)
        + b1, 0.0)                                            # [S*E, H]

    # dst-only scatter-sum onto nodes: msg = dst_oh^T @ h_e
    msg = lax.dot_general(dst_oh, h_e, (((0,), (0,)), ((), ())),
                          preferred_element_type=f32)         # [S*N, H]

    # node MLP (split weights == concat([pos, msg]) @ W2)
    h_n = jnp.maximum(
        jnp.dot(pos, w2p, preferred_element_type=f32)
        + jnp.dot(msg, w2m, preferred_element_type=f32)
        + b2, 0.0)                                            # [S*N, H]

    # per-graph pooling: lane-padded node->graph one-hot (cols >= S*B stay zero)
    graph_l = lax.broadcasted_iota(jnp.int32, (SN, OUT_W), 1)
    node_graph_oh = (graph_l == batch_c).astype(f32)          # [S*N, OUT_W]
    pooled_sum = lax.dot_general(node_graph_oh, h_n, (((0,), (0,)), ((), ())),
                                 preferred_element_type=f32)  # [OUT_W, H]
    counts = jnp.maximum(
        jnp.sum(node_graph_oh, axis=0, keepdims=True), 1.0)   # [1, OUT_W]

    # scoring head: mean(h_n) @ w3 + b3 == (sum(h_n) @ w3) / count + b3
    scores_sum = lax.dot_general(w3r, pooled_sum, (((1,), (1,)), ((), ())),
                                 preferred_element_type=f32)  # [1, OUT_W]
    out_ref[...] = scores_sum / counts + b3                   # single lane-dense store


# --------------------------- host-side packing ---------------------------

def pack_params(params):
    """Pack all weights/biases into one 8-row-aligned f32 slab [W_ROWS, HID]."""
    w1 = params["w1"].astype(jnp.float32)          # [2P + A + 1, H]
    slab = jnp.zeros((W_ROWS, HID), jnp.float32)
    slab = slab.at[_W1PS:_W1PS + POS_DIM, :].set(w1[0:POS_DIM])
    slab = slab.at[_W1PD:_W1PD + POS_DIM, :].set(w1[POS_DIM:2 * POS_DIM])
    slab = slab.at[_W1AW:_W1AW + ATTR_DIM + 1, :].set(w1[2 * POS_DIM:])
    slab = slab.at[_B1:_B1 + 1, :].set(params["b1"].astype(jnp.float32))
    slab = slab.at[_W2P:_W2P + POS_DIM, :].set(params["w2p"].astype(jnp.float32))
    slab = slab.at[_W2M:_W2M + HID, :].set(params["w2m"].astype(jnp.float32))
    slab = slab.at[_B2:_B2 + 1, :].set(params["b2"].astype(jnp.float32))
    slab = slab.at[_W3:_W3 + 1, :].set(params["w3"].astype(jnp.float32).T)
    slab = slab.at[_B3, 0].set(params["b3"].astype(jnp.float32)[0, 0])
    return slab


def pack_samples(samples, n_graphs):
    """Pack S layouts into one int slab [S*(E+N), IDX_W] and float slab [S*(E+N), FEAT_W]."""
    S = len(samples)
    N = samples[0][0].shape[0]
    E = samples[0][2].shape[0]
    idx = jnp.zeros((S * E + S * N, IDX_W), jnp.int32)
    dat = jnp.zeros((S * E + S * N, FEAT_W), jnp.float32)
    for s, (pos, aggr_index, aggr_attr, aggr_weight, batch) in enumerate(samples):
        src = aggr_index[0].astype(jnp.int32) + s * N
        dst = aggr_index[1].astype(jnp.int32) + s * N
        bat = batch.astype(jnp.int32) + s * n_graphs
        e0, p0 = s * E, S * E + s * N
        idx = idx.at[e0:e0 + E, 0].set(src)
        idx = idx.at[e0:e0 + E, 1].set(dst)
        idx = idx.at[p0:p0 + N, 0].set(bat)
        dat = dat.at[e0:e0 + E, 0:ATTR_DIM].set(aggr_attr.astype(jnp.float32))
        dat = dat.at[e0:e0 + E, ATTR_DIM].set(aggr_weight.astype(jnp.float32))
        dat = dat.at[p0:p0 + N, 0:POS_DIM].set(pos.astype(jnp.float32))
    return idx, dat


def discriminator_forward(idx_slab, data_slab, wslab, *, n_samples, n_graphs,
                          n_edges, n_nodes):
    """Fused forward: all samples in one kernel step, one lane-dense score row."""
    assert n_samples * n_graphs <= OUT_LANES
    kernel = functools.partial(discriminator_kernel, S=n_samples, E=n_edges,
                               N=n_nodes, B=n_graphs, OUT_W=OUT_LANES)
    out = pl.pallas_call(
        kernel,
        out_shape=jax.ShapeDtypeStruct((1, OUT_LANES), jnp.float32),
        grid=(1,),
        in_specs=[
            pl.BlockSpec(idx_slab.shape, lambda i: (0, 0)),
            pl.BlockSpec(data_slab.shape, lambda i: (0, 0)),
            pl.BlockSpec(wslab.shape, lambda i: (0, 0)),
        ],
        out_specs=pl.BlockSpec((1, OUT_LANES), lambda i: (0, 0)),
        compiler_params=pltpu.CompilerParams(dimension_semantics=("arbitrary",)),
    )(idx_slab, data_slab, wslab)
    return out[0, :n_samples * n_graphs].reshape(n_samples, n_graphs, 1)


def discriminator_data_adaptor(pos, aggr_index, aggr_attr, aggr_weight, batch,
                               params, num_graphs):
    """Pallas equivalent of DiscriminatorDataAdaptor.forward(layout) (one layout)."""
    wslab = pack_params(params)
    idx, dat = pack_samples([(pos, aggr_index, aggr_attr, aggr_weight, batch)],
                            num_graphs)
    return discriminator_forward(idx, dat, wslab, n_samples=1, n_graphs=num_graphs,
                                 n_edges=aggr_attr.shape[0], n_nodes=pos.shape[0])[0]


# --------------------------- pure-JAX reference ---------------------------

def reference_forward(pos, aggr_index, aggr_attr, aggr_weight, batch,
                      params, num_graphs):
    edge_attr = jnp.concatenate([aggr_attr, aggr_weight[:, None]], axis=1)
    src, dst = aggr_index[0], aggr_index[1]
    edge_in = jnp.concatenate([pos[src], pos[dst], edge_attr], axis=1)
    h_e = jax.nn.relu(edge_in @ params["w1"] + params["b1"])
    msg = jax.ops.segment_sum(h_e, dst, num_segments=pos.shape[0])
    h_n = jax.nn.relu(pos @ params["w2p"] + msg @ params["w2m"] + params["b2"])
    pooled = jax.ops.segment_sum(h_n, batch, num_segments=num_graphs)
    counts = jnp.maximum(
        jax.ops.segment_sum(jnp.ones((pos.shape[0], 1), jnp.float32), batch,
                            num_segments=num_graphs), 1.0)
    pooled = pooled / counts
    return pooled @ params["w3"] + params["b3"]


def init_params(key):
    ks = jax.random.split(key, 4)
    in1 = 2 * POS_DIM + ATTR_DIM + 1
    return {
        "w1": 0.1 * jax.random.normal(ks[0], (in1, HID), jnp.float32),
        "b1": jnp.zeros((1, HID), jnp.float32),
        "w2p": 0.1 * jax.random.normal(ks[1], (POS_DIM, HID), jnp.float32),
        "w2m": 0.1 * jax.random.normal(ks[2], (HID, HID), jnp.float32),
        "b2": jnp.zeros((1, HID), jnp.float32),
        "w3": 0.1 * jax.random.normal(ks[3], (HID, 1), jnp.float32),
        "b3": jnp.zeros((1, 1), jnp.float32),
    }


def make_sample(key):
    ks = jax.random.split(key, 6)
    pos = jax.random.normal(ks[0], (N_NODES, POS_DIM), jnp.float32)
    aggr_attr = jax.random.normal(ks[1], (N_EDGES, ATTR_DIM), jnp.float32)
    aggr_weight = jax.random.uniform(ks[2], (N_EDGES,), jnp.float32)
    batch = jnp.concatenate([jnp.zeros(N_NODES // 2, jnp.int32),
                             jnp.ones(N_NODES // 2, jnp.int32)])
    half = N_EDGES // 2
    src = jnp.concatenate([jax.random.randint(ks[3], (half,), 0, N_NODES // 2),
                           jax.random.randint(ks[4], (half,), N_NODES // 2, N_NODES)])
    dst = jnp.concatenate([jax.random.randint(ks[5], (half,), 0, N_NODES // 2),
                           jax.random.randint(jax.random.fold_in(ks[5], 1), (half,),
                                              N_NODES // 2, N_NODES)])
    aggr_index = jnp.stack([src, dst]).astype(jnp.int32)
    return pos, aggr_index, aggr_attr, aggr_weight, batch


if __name__ == "__main__":
    key = jax.random.PRNGKey(0)
    params = init_params(jax.random.fold_in(key, 999))
    wslab = pack_params(params)

    samples = [make_sample(jax.random.fold_in(key, s)) for s in range(N_SAMPLES)]
    refs = jnp.stack([reference_forward(*s, params, N_GRAPHS) for s in samples])

    # fused path: all S independent layouts in a single kernel step
    idx_slab, data_slab = pack_samples(samples, N_GRAPHS)
    scores = discriminator_forward(idx_slab, data_slab, wslab,
                                   n_samples=N_SAMPLES, n_graphs=N_GRAPHS,
                                   n_edges=N_EDGES, n_nodes=N_NODES)
    scores = jax.block_until_ready(scores)
    assert scores.shape == (N_SAMPLES, N_GRAPHS, 1)
    assert jnp.allclose(scores, refs, atol=1e-4, rtol=1e-4), (scores, refs)

    # single-layout adaptor path (original module signature)
    score0 = discriminator_data_adaptor(*samples[0], params, N_GRAPHS)
    score0 = jax.block_until_ready(score0)
    assert score0.shape == (N_GRAPHS, 1)
    assert jnp.allclose(score0, refs[0], atol=1e-4, rtol=1e-4), (score0, refs[0])

    print("KERNEL_OK")
</pallas_src>

<mosaic_0001>
module attributes {stable_mosaic.version = 11 : i64} {
  func.func @discriminator_kernel(%arg0: i32, %arg1: memref<192x8xi32, #tpu.memory_space<vmem>>, %arg2: memref<192x4xf32, #tpu.memory_space<vmem>>, %arg3: memref<96x32xf32, #tpu.memory_space<vmem>>, %arg4: memref<1x128xf32, #tpu.memory_space<vmem>>) attributes {dimension_semantics = [#tpu.dimension_semantics<arbitrary>], iteration_bounds = array<i64: 1>, scalar_prefetch = 0 : i64, scratch_operands = 0 : i64, tpu.core_type = #tpu.core_type<tc>, window_params = [{pipeline_mode = #tpu.pipeline_mode<synchronous>, transform_indices = @transform_0, window_bounds = array<i64: 192, 8>}, {pipeline_mode = #tpu.pipeline_mode<synchronous>, transform_indices = @transform_1, window_bounds = array<i64: 192, 4>}, {pipeline_mode = #tpu.pipeline_mode<synchronous>, transform_indices = @transform_2, window_bounds = array<i64: 96, 32>}, {pipeline_mode = #tpu.pipeline_mode<synchronous>, transform_indices = @transform_3, window_bounds = array<i64: 1, 128>}]} {
    %c0 = arith.constant 0 : index
    %c0_0 = arith.constant 0 : index
    %0 = vector.load %arg3[%c0, %c0_0] : memref<96x32xf32, #tpu.memory_space<vmem>>, vector<4x32xf32>
    %c8 = arith.constant 8 : index
    %c0_1 = arith.constant 0 : index
    %1 = vector.load %arg3[%c8, %c0_1] : memref<96x32xf32, #tpu.memory_space<vmem>>, vector<4x32xf32>
    %c16 = arith.constant 16 : index
    %c0_2 = arith.constant 0 : index
    %2 = vector.load %arg3[%c16, %c0_2] : memref<96x32xf32, #tpu.memory_space<vmem>>, vector<4x32xf32>
    %c24 = arith.constant 24 : index
    %c0_3 = arith.constant 0 : index
    %3 = vector.load %arg3[%c24, %c0_3] : memref<96x32xf32, #tpu.memory_space<vmem>>, vector<1x32xf32>
    %c32 = arith.constant 32 : index
    %c0_4 = arith.constant 0 : index
    %4 = vector.load %arg3[%c32, %c0_4] : memref<96x32xf32, #tpu.memory_space<vmem>>, vector<4x32xf32>
    %c40 = arith.constant 40 : index
    %c0_5 = arith.constant 0 : index
    %5 = vector.load %arg3[%c40, %c0_5] : memref<96x32xf32, #tpu.memory_space<vmem>>, vector<32x32xf32>
    %c72 = arith.constant 72 : index
    %c0_6 = arith.constant 0 : index
    %6 = vector.load %arg3[%c72, %c0_6] : memref<96x32xf32, #tpu.memory_space<vmem>>, vector<1x32xf32>
    %c80 = arith.constant 80 : index
    %c0_7 = arith.constant 0 : index
    %7 = vector.load %arg3[%c80, %c0_7] : memref<96x32xf32, #tpu.memory_space<vmem>>, vector<1x32xf32>
    %c88 = arith.constant 88 : index
    %c0_8 = arith.constant 0 : index
    %8 = vector.load %arg3[%c88, %c0_8] : memref<96x32xf32, #tpu.memory_space<vmem>>, vector<1x1xf32>
    %c0_9 = arith.constant 0 : index
    %c0_10 = arith.constant 0 : index
    %9 = vector.load %arg2[%c0_9, %c0_10] : memref<192x4xf32, #tpu.memory_space<vmem>>, vector<128x4xf32>
    %c128 = arith.constant 128 : index
    %c0_11 = arith.constant 0 : index
    %10 = vector.load %arg2[%c128, %c0_11] : memref<192x4xf32, #tpu.memory_space<vmem>>, vector<64x4xf32>
    %c0_12 = arith.constant 0 : index
    %c0_13 = arith.constant 0 : index
    %11 = vector.load %arg1[%c0_12, %c0_13] : memref<192x8xi32, #tpu.memory_space<vmem>>, vector<128x1xi32>
    %c0_14 = arith.constant 0 : index
    %c1 = arith.constant 1 : index
    %12 = vector.load %arg1[%c0_14, %c1] : memref<192x8xi32, #tpu.memory_space<vmem>>, vector<128x1xi32>
    %c128_15 = arith.constant 128 : index
    %c0_16 = arith.constant 0 : index
    %13 = vector.load %arg1[%c128_15, %c0_16] : memref<192x8xi32, #tpu.memory_space<vmem>>, vector<64x1xi32>
    %14 = tpu.iota {dimensions = array<i32: 1>} : vector<128x64xi32>
    %15 = vector.broadcast %11 : vector<128x1xi32> to vector<128x64xi32>
    %16 = arith.cmpi eq, %14, %15 : vector<128x64xi32>
    %17 = arith.extui %16 : vector<128x64xi1> to vector<128x64xi32>
    %18 = arith.sitofp %17 : vector<128x64xi32> to vector<128x64xf32>
    %19 = vector.broadcast %12 : vector<128x1xi32> to vector<128x64xi32>
    %20 = arith.cmpi eq, %14, %19 : vector<128x64xi32>
    %21 = arith.extui %20 : vector<128x64xi1> to vector<128x64xi32>
    %22 = arith.sitofp %21 : vector<128x64xi32> to vector<128x64xf32>
    %cst = arith.constant dense<0.000000e+00> : vector<64x32xf32>
    %23 = tpu.matmul %10, %0, %cst {dimension_numbers = #tpu.dot_dimension_numbers<[1], [0], [0], [1], [0, 0, 1, 1], [], []>} : vector<64x4xf32>, vector<4x32xf32>, vector<64x32xf32> -> vector<64x32xf32>
    %cst_17 = arith.constant dense<0.000000e+00> : vector<64x32xf32>
    %24 = tpu.matmul %10, %1, %cst_17 {dimension_numbers = #tpu.dot_dimension_numbers<[1], [0], [0], [1], [0, 0, 1, 1], [], []>} : vector<64x4xf32>, vector<4x32xf32>, vector<64x32xf32> -> vector<64x32xf32>
    %cst_18 = arith.constant dense<0.000000e+00> : vector<128x32xf32>
    %25 = tpu.matmul %18, %23, %cst_18 {dimension_numbers = #tpu.dot_dimension_numbers<[1], [0], [0], [1], [0, 0, 1, 1], [], []>} : vector<128x64xf32>, vector<64x32xf32>, vector<128x32xf32> -> vector<128x32xf32>
    %cst_19 = arith.constant dense<0.000000e+00> : vector<128x32xf32>
    %26 = tpu.matmul %22, %24, %cst_19 {dimension_numbers = #tpu.dot_dimension_numbers<[1], [0], [0], [1], [0, 0, 1, 1], [], []>} : vector<128x64xf32>, vector<64x32xf32>, vector<128x32xf32> -> vector<128x32xf32>
    %27 = arith.addf %25, %26 : vector<128x32xf32>
    %cst_20 = arith.constant dense<0.000000e+00> : vector<128x32xf32>
    %28 = tpu.matmul %9, %2, %cst_20 {dimension_numbers = #tpu.dot_dimension_numbers<[1], [0], [0], [1], [0, 0, 1, 1], [], []>} : vector<128x4xf32>, vector<4x32xf32>, vector<128x32xf32> -> vector<128x32xf32>
    %29 = arith.addf %27, %28 : vector<128x32xf32>
    %30 = vector.broadcast %3 : vector<1x32xf32> to vector<128x32xf32>
    %31 = arith.addf %29, %30 : vector<128x32xf32>
    %cst_21 = arith.constant 0.000000e+00 : f32
    %32 = vector.broadcast %cst_21 : f32 to vector<128x32xf32>
    %33 = arith.maximumf %31, %32 : vector<128x32xf32>
    %cst_22 = arith.constant dense<0.000000e+00> : vector<64x32xf32>
    %34 = tpu.matmul %22, %33, %cst_22 {dimension_numbers = #tpu.dot_dimension_numbers<[0], [0], [1], [1], [0, 1, 1, 1], [], []>} : vector<128x64xf32>, vector<128x32xf32>, vector<64x32xf32> -> vector<64x32xf32>
    %cst_23 = arith.constant dense<0.000000e+00> : vector<64x32xf32>
    %35 = tpu.matmul %10, %4, %cst_23 {dimension_numbers = #tpu.dot_dimension_numbers<[1], [0], [0], [1], [0, 0, 1, 1], [], []>} : vector<64x4xf32>, vector<4x32xf32>, vector<64x32xf32> -> vector<64x32xf32>
    %cst_24 = arith.constant dense<0.000000e+00> : vector<64x32xf32>
    %36 = tpu.matmul %34, %5, %cst_24 {dimension_numbers = #tpu.dot_dimension_numbers<[1], [0], [0], [1], [0, 0, 1, 1], [], []>} : vector<64x32xf32>, vector<32x32xf32>, vector<64x32xf32> -> vector<64x32xf32>
    %37 = arith.addf %35, %36 : vector<64x32xf32>
    %38 = vector.broadcast %6 : vector<1x32xf32> to vector<64x32xf32>
    %39 = arith.addf %37, %38 : vector<64x32xf32>
    %cst_25 = arith.constant 0.000000e+00 : f32
    %40 = vector.broadcast %cst_25 : f32 to vector<64x32xf32>
    %41 = arith.maximumf %39, %40 : vector<64x32xf32>
    %42 = tpu.iota {dimensions = array<i32: 1>} : vector<64x128xi32>
    %43 = vector.broadcast %13 : vector<64x1xi32> to vector<64x128xi32>
    %44 = arith.cmpi eq, %42, %43 : vector<64x128xi32>
    %45 = arith.extui %44 : vector<64x128xi1> to vector<64x128xi32>
    %46 = arith.sitofp %45 : vector<64x128xi32> to vector<64x128xf32>
    %cst_26 = arith.constant dense<0.000000e+00> : vector<128x32xf32>
    %47 = tpu.matmul %46, %41, %cst_26 {dimension_numbers = #tpu.dot_dimension_numbers<[0], [0], [1], [1], [0, 1, 1, 1], [], []>} : vector<64x128xf32>, vector<64x32xf32>, vector<128x32xf32> -> vector<128x32xf32>
    %cst_27 = arith.constant dense<0.000000e+00> : vector<128xf32>
    %48 = vector.multi_reduction <add>, %46, %cst_27 [0] : vector<64x128xf32> to vector<128xf32>
    %49 = vector.shape_cast %48 : vector<128xf32> to vector<1x128xf32>
    %cst_28 = arith.constant 1.000000e+00 : f32
    %50 = vector.broadcast %cst_28 : f32 to vector<1x128xf32>
    %51 = arith.maximumf %49, %50 : vector<1x128xf32>
    %cst_29 = arith.constant dense<0.000000e+00> : vector<1x128xf32>
    %52 = tpu.matmul %7, %47, %cst_29 {dimension_numbers = #tpu.dot_dimension_numbers<[1], [1], [0], [0], [0, 0, 1, 0], [], []>} : vector<1x32xf32>, vector<128x32xf32>, vector<1x128xf32> -> vector<1x128xf32>
    %53 = arith.divf %52, %51 : vector<1x128xf32>
    %54 = vector.broadcast %8 : vector<1x1xf32> to vector<1x128xf32>
    %55 = arith.addf %53, %54 : vector<1x128xf32>
    %c0_30 = arith.constant 0 : index
    %c0_31 = arith.constant 0 : index
    %56 = vector.load %arg4[%c0_30, %c0_31] : memref<1x128xf32, #tpu.memory_space<vmem>>, vector<1x128xf32>
    tpu.vector_store %arg4[%c0_30, %c0_31], %55 {strides = array<i32>} : memref<1x128xf32, #tpu.memory_space<vmem>>, vector<1x128xf32>,
    return
  }
  func.func @transform_0(%arg0: i32) -> (i32, i32) {
    %c0_i32 = arith.constant 0 : i32
    %c0_i32_0 = arith.constant 0 : i32
    %c0_i32_1 = arith.constant 0 : i32
    return %c0_i32, %c0_i32_0 : i32, i32
  }
  func.func @transform_1(%arg0: i32) -> (i32, i32) {
    %c0_i32 = arith.constant 0 : i32
    %c0_i32_0 = arith.constant 0 : i32
    %c0_i32_1 = arith.constant 0 : i32
    return %c0_i32, %c0_i32_0 : i32, i32
  }
  func.func @transform_2(%arg0: i32) -> (i32, i32) {
    %c0_i32 = arith.constant 0 : i32
    %c0_i32_0 = arith.constant 0 : i32
    %c0_i32_1 = arith.constant 0 : i32
    return %c0_i32, %c0_i32_0 : i32, i32
  }
  func.func @transform_3(%arg0: i32) -> (i32, i32) {
    %c0_i32 = arith.constant 0 : i32
    %c0_i32_0 = arith.constant 0 : i32
    %c0_i32_1 = arith.constant 0 : i32
    return %c0_i32, %c0_i32_0 : i32, i32
  }
}

</mosaic_0001>

<bundles_post_ra>
// kernel: tpu_custom_call.1
= control target key start
LH: loop header
LB: loop body
LE: loop exit
PB: predicated region body
PF: predicated region fallthrough
CT: control target
= control target key end

     0   :  { %vm2319_vm0 = vcmask 1043456   ;;  %vm269_vm1 = vcmask 31744   ;;  %v1563_v6 = vmov 1   ;;  %s2315_s0 = inlined_call_operand.vmem [shape: s32[192,8], index: 0, kind: input, shape index: {}]   ;;  %s2316_s1 = inlined_call_operand.vmem [shape: f32[192,4], index: 1, kind: input, shape index: {}]   ;;  %s2317_s2 = inlined_call_operand.vmem [shape: f32[96,32], index: 2, kind: input, shape index: {}]   ;;  %s2318_s3 = inlined_call_operand.hbm [shape: f32[1,128], index: 3, kind: output, shape index: {}]  }
   0x1   :  { %v15_v0 = vld [vmem:[%s2317_s2] sm:$0xf]  ;;  %v16_v1 = vld [vmem:[%s2317_s2 + $0x8] sm:$0xf]  ;;  %v45_v3 = vld [vmem:[%s2316_s1 + $0x90] sm:$0xff]  ;;  %1516 = vset.pattern.permute.xlu2 %v1563_v6  ;;  %1515 = vset.pattern.permute.xlu1 %v1563_v6 }
   0x2   :  { %v1598_v2 = vld [vmem:[%s2316_s1 + $0x80] sm:$0xff]  ;;  %1323 = vmatpush.msk.msra.mxu0 %vm2319_vm0, %v15_v0  ;;  %1448 = vmatpush.msk.msra.mxu1 %vm2319_vm0, %v16_v1  ;;  %v1613_v5 = vld [vmem:[%s2315_s0 + $0x10] sm:$0xff]  ;;  %v1633_v8 = vld [vmem:[%s2316_s1 + $0x88] sm:$0xff] }
   0x3   :  { %v1608_v4 = vld [vmem:[%s2315_s0 + $0x20] sm:$0xff]  ;;  %1324 = vmatmul.msk.f32.vlgmr.msra.gmra.mxu0 %vm269_vm1, %v1598_v2  ;;  %1335 = vmatmul.msk.f32.vlgmr.msra.gmra.mxu1 %vm269_vm1, %v45_v3  ;;  %v46_v9 = vld [vmem:[%s2316_s1 + $0x98] sm:$0xff] }
   0x4   :  { %v1623_v7 = vld [vmem:[%s2315_s0] sm:$0xff]  ;;  %186 = vperm.xlu2 %1516, %v1608_v4   ;;  %180 = vperm.xlu1 %1515, %v1613_v5  }
   0x5   :  { %1514 = vset.pattern.permute.xlu0 %v1563_v6  ;;  %1332 = vmatpush.msk.msrb.mxu0 %vm2319_vm0, %v16_v1 }
   0x6   :  { %174 = vperm.xlu0 %1514, %v1623_v7  }
   0x7   :  { %8 = vsyncpa [#allocation3], 0  ;;  %v1641_v10 = vld [vmem:[%s2315_s0 + $0x28] sm:$0xff]  ;;  %v54_v11 = vld [vmem:[%s2315_s0 + $0x18] sm:$0xff]  ;;  %v1564_v16 = vmov 0   ;;  %v75_v0 = vlaneseq  ;;  %s1282_s29 = sshll.u32 %s2318_s3, 4  ;;  %s1283_s29 = int_to_ptr.hbm [resolvable:$true] %s1282_s29 }
   0x8   :  { %v1652_v12 = vld [vmem:[%s2315_s0 + $0x8] sm:$0xff]  ;;  %v1659_v13 = vld [vmem:[%s2316_s1 + $0xa0] sm:$0xff]  ;;  %v57_v14 = vld [vmem:[%s2315_s0 + $0x30] sm:$0xff] }
   0x9   :  { %v58_v15 = vld [vmem:[%s2315_s0 + $0x38] sm:$0xff]  ;;  %v1673_v17 = vld [vmem:[%s2316_s1 + $0xa8] sm:$0xff]  ;;  %v59_v18 = vld [vmem:[%s2315_s0 + $0x40] sm:$0xff] }
   0xa   :  { %v1684_v19 = vld [vmem:[%s2316_s1 + $0xb0] sm:$0xff]  ;;  %v60_v20 = vld [vmem:[%s2315_s0 + $0x48] sm:$0xff]  ;;  %v62_v21 = vld [vmem:[%s2315_s0 + $0x58] sm:$0xff] }
   0xb   :  { %1325 = vmatmul.msk.f32.gmra.mxu0 %vm269_vm1, %v1633_v8  ;;  %1336 = vmatmul.msk.f32.gmra.mxu1 %vm269_vm1, %v46_v9  ;;  %v1701_v22 = vld [vmem:[%s2316_s1 + $0xb8] sm:$0xff]  ;;  %v61_v23 = vld [vmem:[%s2315_s0 + $0x50] sm:$0xff]  ;;  %v64_v24 = vld [vmem:[%s2315_s0 + $0x68] sm:$0xff] }
   0xc   :  { %189 = vperm.xlu2 %1516, %v1641_v10   ;;  %183 = vperm.xlu1 %1515, %v54_v11   ;;  %v63_v25 = vld [vmem:[%s2315_s0 + $0x60] sm:$0xff]  ;;  %v65_v26 = vld [vmem:[%s2315_s0 + $0x70] sm:$0xff]  ;;  %v66_v27 = vld [vmem:[%s2315_s0 + $0x78] sm:$0xff] }
   0xd   :  { %v67_v31 = vld [vmem:[%s2315_s0 + $0x80] sm:$0xff]  ;;  %v69_v40 = vld [vmem:[%s2315_s0 + $0x90] sm:$0xff]  ;;  %v70_v45 = vld [vmem:[%s2315_s0 + $0x98] sm:$0xff] }
   0xe   :  { %177 = vperm.xlu0 %1514, %v1652_v12   ;;  %v72_v50 = vld [vmem:[%s2315_s0 + $0xa8] sm:$0xff]  ;;  %v73_v52 = vld [vmem:[%s2315_s0 + $0xb0] sm:$0xff]  ;;  %v71_v1 = vld [vmem:[%s2315_s0 + $0xa0] sm:$0xff] }
   0xf   :  { %v68_v53 = vld [vmem:[%s2315_s0 + $0x88] sm:$0xff] }
  0x13   :  { %1326 = vmatmul.msk.f32.gmra.mxu0 %vm269_vm1, %v45_v3  ;;  %1337 = vmatmul.msk.f32.gmra.mxu1 %vm269_vm1, %v1659_v13  ;;  %v1812_v3 = vand.u32 127, %v75_v0 }
  0x14   :  { %1518 = vset.pattern.permute.xlu2 %v1564_v16  ;;  %192 = vperm.xlu1 %1515, %v57_v14  }
  0x15   :  { %99 = vperm.xlu2 %1518, %v58_v15  }
  0x16   :  { %1517 = vset.pattern.permute.xlu0 %v1564_v16 }
  0x17   :  { %96 = vperm.xlu0 %1517, %v57_v14  }
  0x1b   :  { %1327 = vmatmul.msk.f32.gmra.mxu0 %vm269_vm1, %v46_v9  ;;  %1338 = vmatmul.msk.f32.gmra.mxu1 %vm269_vm1, %v1673_v17 }
  0x1c   :  { %195 = vperm.xlu1 %1515, %v58_v15   ;;  %v17_v15 = vld [vmem:[%s2317_s2 + $0x10] sm:$0xf] }
  0x1d   :  { %102 = vperm.xlu2 %1518, %v59_v18   ;;  %1373 = vmatpush.msk.msra.mxu0 %vm2319_vm0, %v17_v15 }
  0x1f   :  { %1519 = vset.pattern.permute.xlu0 %v1563_v6 }
  0x20   :  { %198 = vperm.xlu0 %1519, %v59_v18  }
  0x23   :  { %1328 = vmatmul.msk.f32.gmra.mxu0 %vm269_vm1, %v1659_v13  ;;  %1339 = vmatmul.msk.f32.gmra.mxu1 %vm269_vm1, %v1684_v19 }
  0x24   :  { %1520 = vset.pattern.permute.xlu1 %v1564_v16 }
  0x25   :  { %1521 = vset.pattern.permute.xlu2 %v1563_v6  ;;  %105 = vperm.xlu1 %1520, %v60_v20  }
  0x26   :  { %201 = vperm.xlu2 %1521, %v60_v20   ;;  %v28_v20 = vld [vmem:[%s2316_s1 + $0x8] sm:$0xff] }
  0x28   :  { %1522 = vset.pattern.permute.xlu0 %v1564_v16 }
  0x29   :  { %111 = vperm.xlu0 %1522, %v62_v21  }
  0x2b   :  { %1329 = vmatmul.msk.f32.gmra.mxu0 %vm269_vm1, %v1673_v17  ;;  %1340 = vmatmul.msk.f32.gmra.mxu1 %vm269_vm1, %v1701_v22 }
  0x2d   :  { %108 = vperm.xlu1 %1520, %v61_v23  }
  0x2e   :  { %204 = vperm.xlu2 %1521, %v61_v23  }
  0x31   :  { %1525 = vset.pattern.permute.xlu0 %v1563_v6 }
  0x32   :  { %213 = vperm.xlu0 %1525, %v64_v24  }
  0x33   :  { %1330 = vmatmul.msk.f32.gmra.mxu0 %vm269_vm1, %v1684_v19 }
  0x35   :  { %1523 = vset.pattern.permute.xlu1 %v1563_v6 }
  0x36   :  { %1524 = vset.pattern.permute.xlu2 %v1564_v16  ;;  %207 = vperm.xlu1 %1523, %v62_v21  }
  0x37   :  { %114 = vperm.xlu2 %1524, %v63_v25  }
  0x3a   :  { %1528 = vset.pattern.permute.xlu0 %v1564_v16 }
  0x3b   :  { %1331 = vmatmul.msk.f32.gmra.mxu0 %vm269_vm1, %v1701_v22  ;;  %78 = vperm.xlu0 %1528, %v1623_v7  }
  0x3e   :  { %210 = vperm.xlu1 %1523, %v63_v25  }
  0x3f   :  { %117 = vperm.xlu2 %1524, %v64_v24   ;;  %v29_v24 = vld [vmem:[%s2316_s1 + $0x10] sm:$0xff] }
  0x43   :  { %1333 = vmatmul.msk.f32.vlgmr.msrb.gmra.mxu0 %vm269_vm1, %v1598_v2  ;;  %87 = vperm.xlu0 %1528, %v54_v11   ;;  %v26_v2 = vld [vmem:[%s2317_s2 + $0x58] sm:$0x1] }
  0x44   :  { %v74_v11 = vld [vmem:[%s2315_s0 + $0xb8] sm:$0xff] }
  0x46   :  { %1526 = vset.pattern.permute.xlu1 %v1564_v16 }
  0x47   :  { %1527 = vset.pattern.permute.xlu2 %v1563_v6  ;;  %120 = vperm.xlu1 %1526, %v65_v26  }
  0x48   :  { %216 = vperm.xlu2 %1527, %v65_v26   ;;  %v1566_v26 = vmov 0.0  }
  0x4b   :  { %1334 = vmatmul.msk.f32.gmra.mxu0 %vm269_vm1, %v1633_v8  ;;  %982 = vperm.xlu0 %1528, %v69_v40  }
  0x4f   :  { %123 = vperm.xlu1 %1526, %v66_v27  }
  0x50   :  { %219 = vperm.xlu2 %1527, %v66_v27  }
  0x53   :  { %991 = vperm.xlu0 %1528, %v72_v50  }
  0x57   :  { %90 = vperm.xlu1 %1526, %v1608_v4  }
  0x58   :  { %1529 = vset.pattern.permute.xlu2 %v1564_v16  ;;  %v27_v16 = vld [vmem:[%s2316_s1] sm:$0xff] }
  0x59   :  { %81 = vperm.xlu2 %1529, %v1652_v12   ;;  %1374 = vmatmul.msk.f32.vlgmr.msra.gmra.mxu0 %vm269_vm1, %v27_v16  ;;  %v36_v16 = vld [vmem:[%s2316_s1 + $0x48] sm:$0xff] }
  0x5e   :  { %v1736_v28 = vpop.permute.xlu2 %186 }
  0x5f   :  { %93 = vperm.xlu1 %1526, %v1641_v10   ;;  %v1565_v10 = vmov 1.0   ;;  %vm225_vm13 = vcmp.eq.s32.totalorder %v1812_v3, %v1736_v28 }
  0x61   :  { %84 = vperm.xlu2 %1529, %v1613_v5   ;;  %1375 = vmatmul.msk.f32.gmra.mxu0 %vm269_vm1, %v28_v20 }
  0x66   :  { %v1740_v29 = vpop.permute.xlu2 %189 }
  0x67   :  { %976 = vperm.xlu1 %1526, %v67_v31   ;;  %vm226_vm12 = vcmp.eq.s32.totalorder %v1812_v3, %v1740_v29 }
  0x69   :  { %979 = vperm.xlu2 %1529, %v68_v53   ;;  %1376 = vmatmul.msk.f32.gmra.mxu0 %vm269_vm1, %v29_v24 }
  0x6f   :  { %v1742_v30 = vpop.permute.xlu2 %99  ;;  %985 = vperm.xlu1 %1526, %v70_v45   ;;  %v30_v45 = vld [vmem:[%s2316_s1 + $0x18] sm:$0xff] }
  0x71   :  { %988 = vperm.xlu2 %1529, %v71_v1   ;;  %1377 = vmatmul.msk.f32.gmra.mxu0 %vm269_vm1, %v30_v45  ;;  %v34_v1 = vld [vmem:[%s2316_s1 + $0x38] sm:$0xff] }
  0x76   :  { %v1747_v32 = vpop.permute.xlu1 %180 }
  0x77   :  { %v1749_v33 = vpop.permute.xlu2 %102  ;;  %994 = vperm.xlu1 %1526, %v73_v52   ;;  %v31_v52 = vld [vmem:[%s2316_s1 + $0x20] sm:$0xff] }
  0x78   :  { %v1751_v34 = vpop.permute.xlu0 %174 }
  0x79   :  { %997 = vperm.xlu2 %1529, %v74_v11   ;;  %1378 = vmatmul.msk.f32.gmra.mxu0 %vm269_vm1, %v31_v52  ;;  %v38_v52 = vld [vmem:[%s2316_s1 + $0x58] sm:$0xff] }
  0x7e   :  { %v1753_v35 = vpop.permute.xlu1 %183 }
  0x7f   :  { %1270 = vperm.xlu1 %1526, %v26_v2   ;;  %vm224_vm15 = vcmp.eq.s32.totalorder %v1812_v3, %v1753_v35  ;;  %v1311_v35 = vsel %vm225_vm13, 1.0, %v1566_v26 }
  0x80   :  { %v1755_v36 = vpop.f32.mrf.mxu0  ;;  %v365_v37 = vpop.f32.mrf.mxu1 }
  0x81   :  { %v1757_v38 = vpop.permute.xlu2 %201  ;;  %v1759_v39 = vpop.permute.xlu0 %177 }
  0x82   :  { %vm230_vm8 = vcmp.eq.s32.totalorder %v1812_v3, %v1757_v38  ;;  %v40_v38 = vld [vmem:[%s2316_s1 + $0x68] sm:$0xff] }
  0x86   :  { %v1764_v41 = vpop.permute.xlu1 %192 }
  0x87   :  { %vm227_vm11 = vcmp.eq.s32.totalorder %v1812_v3, %v1764_v41 }
  0x88   :  { %v1766_v42 = vpop.f32.mrf.mxu0  ;;  %v368_v43 = vpop.f32.mrf.mxu1 }
  0x89   :  { %v1768_v44 = vpop.permute.xlu2 %204  ;;  %v1773_v46 = vpop.permute.xlu0 %96 }
  0x8a   :  { %vm231_vm7 = vcmp.eq.s32.totalorder %v1812_v3, %v1768_v44  ;;  %vm131_vm14 = vcmp.eq.s32.totalorder %v1812_v3, %v1773_v46  ;;  %v41_v44 = vld [vmem:[%s2316_s1 + $0x70] sm:$0xff] }
  0x8b   :  { %v1297_v27 = vsel %vm131_vm14, 1.0, %v1566_v26  ;;  %vm222_vm14 = vcmp.eq.s32.totalorder %v1812_v3, %v1759_v39 }
  0x8c   :  { %v1308_v50 = vsel %vm222_vm14, 1.0, %v1566_v26 }
  0x8e   :  { %v1775_v47 = vpop.permute.xlu1 %195 }
  0x8f   :  { %vm228_vm10 = vcmp.eq.s32.totalorder %v1812_v3, %v1775_v47 }
  0x90   :  { %v1777_v48 = vpop.f32.mrf.mxu0  ;;  %v371_v49 = vpop.f32.mrf.mxu1 }
  0x91   :  { %v1782_v51 = vpop.permute.xlu2 %114 }
  0x92   :  { %v1790_v54 = vpop.permute.xlu0 %198 }
  0x93   :  { %vm229_vm9 = vcmp.eq.s32.totalorder %v1812_v3, %v1790_v54 }
  0x97   :  { %v1794_v57 = vpop.permute.xlu1 %105 }
  0x98   :  { %v1792_v55 = vpop.f32.mrf.mxu0  ;;  %v374_v56 = vpop.f32.mrf.mxu1 }
  0x99   :  { %v1796_v58 = vpop.permute.xlu2 %117 }
  0x9b   :  { %v1802_v62 = vpop.permute.xlu0 %111 }
  0x9f   :  { %v1800_v61 = vpop.permute.xlu1 %108 }
  0xa0   :  { %v1798_v59 = vpop.f32.mrf.mxu0  ;;  %v377_v60 = vpop.f32.mrf.mxu1 }
  0xa2   :  { %v1804_v63 = vpop.permute.xlu2 %216 }
  0xa3   :  { %vm2321_vm2 = vcmp.eq.s32.totalorder %v1812_v3, %v1804_v63 }
  0xa4   :  { %v1820_v9 = vpop.permute.xlu0 %213 }
  0xa5   :  { %vm2322_vm4 = vcmp.eq.s32.totalorder %v1812_v3, %v1820_v9 }
  0xa8   :  { %v1814_v4 = vpop.f32.mrf.mxu0  ;;  %v380_v5 = vpop.f32.mrf.mxu1 }
  0xa9   :  { %v1816_v6 = vpop.permute.xlu1 %207  ;;  %440 = vmatpush.msra.mxu2 %v380_v5 }
  0xaa   :  { %v1818_v7 = vpop.permute.xlu2 %219  ;;  %vm232_vm5 = vcmp.eq.s32.totalorder %v1812_v3, %v1816_v6  ;;  %v42_v6 = vld [vmem:[%s2316_s1 + $0x78] sm:$0xff] }
  0xab   :  { %441 = vmatpush.msra.mxu2 %v377_v60  ;;  %vm2320_vm3 = vcmp.eq.s32.totalorder %v1812_v3, %v1818_v7 }
  0xac   :  { %1493 = vmatpush.lsf.msk.msk.msrb.mxu1 %vm2320_vm3, %v1565_v10  ;;  %vm223_vm3 = vcmp.eq.s32.totalorder %v1812_v3, %v1747_v32 }
  0xad   :  { %442 = vmatpush.msra.mxu2 %v374_v56  ;;  %v79_v23 = vpop.permute.xlu0 %78 }
  0xae   :  { %1494 = vmatpush.lsf.msk.msk.msrb.mxu1 %vm2321_vm2, %v1565_v10  ;;  %vm125_vm0 = vcmp.eq.s32.totalorder %v1812_v3, %v79_v23  ;;  %vm221_vm2 = vcmp.eq.s32.totalorder %v1812_v3, %v1751_v34  ;;  %v1314_v23 = vsel %vm228_vm10, 1.0, %v1566_v26 }
  0xaf   :  { %443 = vmatpush.msra.mxu2 %v371_v49  ;;  %v1291_v31 = vsel %vm125_vm0, 1.0, %v1566_v26  ;;  %vm132_vm0 = vcmp.eq.s32.totalorder %v1812_v3, %v1742_v30 }
  0xb0   :  { %v1839_v12 = vpop.f32.mrf.mxu0  ;;  %1495 = vmatpush.lsf.msk.msk.msrb.mxu1 %vm2322_vm4, %v1565_v10  ;;  %vm383_vm4 = vcmask 523264   ;;  %v1298_v46 = vsel %vm132_vm0, 1.0, %v1566_v26 }
  0xb1   :  { %v1841_v14 = vpop.permute.xlu1 %210  ;;  %444 = vmatpush.msra.mxu2 %v368_v43  ;;  %v1307_v43 = vsel %vm221_vm2, 1.0, %v1566_v26 }
  0xb2   :  { %vm2323_vm6 = vcmp.eq.s32.totalorder %v1812_v3, %v1841_v14 }
  0xb3   :  { %445 = vmatpush.msra.mxu2 %v365_v37  ;;  %1496 = vmatpush.lsf.msk.msk.msrb.mxu1 %vm2323_vm6, %v1565_v10  ;;  %v82_v37 = vpop.permute.xlu2 %81 }
  0xb4   :  { %vm126_vm6 = vcmp.eq.s32.totalorder %v1812_v3, %v82_v37  ;;  %v37_v37 = vld [vmem:[%s2316_s1 + $0x50] sm:$0xff] }
  0xb5   :  { %1497 = vmatpush.lsf.msk.msk.msrb.mxu1 %vm232_vm5, %v1565_v10  ;;  %v1292_v49 = vsel %vm126_vm6, 1.0, %v1566_v26  ;;  %v88_v39 = vpop.permute.xlu0 %87 }
  0xb6   :  { %vm128_vm0 = vcmp.eq.s32.totalorder %v1812_v3, %v88_v39  ;;  %v1317_v39 = vsel %vm231_vm7, 1.0, %v1566_v26 }
  0xb7   :  { %1498 = vmatpush.lsf.msk.msk.msrb.mxu1 %vm231_vm7, %v1565_v10  ;;  %vm2324_vm7 = vcmp.eq.s32.totalorder %v1812_v3, %v1841_v14 }
  0xb8   :  { %v336_v18 = vpop.f32.mrf.mxu0 }
  0xb9   :  { %553 = vmatpush.msra.mxu1 %v336_v18  ;;  %1450 = vmatpush.msra.mxu3 %v336_v18  ;;  %v1931_v25 = vpop.permute.xlu1 %120 }
  0xbb   :  { %1499 = vmatpush.lsf.msk.msk.msrb.mxu1 %vm230_vm8, %v1565_v10  ;;  %1452 = vmatpush.msra.mxu3 %v1839_v12  ;;  %v85_v34 = vpop.permute.xlu2 %84 }
  0xbc   :  { %vm127_vm6 = vcmp.eq.s32.totalorder %v1812_v3, %v85_v34 }
  0xbd   :  { %554 = vmatpush.msra.mxu1 %v1839_v12  ;;  %1454 = vmatpush.msra.mxu3 %v1814_v4 }
  0xbf   :  { %1500 = vmatpush.lsf.msk.msk.msrb.mxu1 %vm229_vm9, %v1565_v10  ;;  %1456 = vmatpush.msra.mxu3 %v1798_v59 }
  0xc0   :  { %v359_v21 = vpop.f32.mrf.mxu0 }
  0xc1   :  { %555 = vmatpush.msra.mxu1 %v1814_v4  ;;  %1458 = vmatpush.msra.mxu3 %v1792_v55  ;;  %v1975_v30 = vpop.permute.xlu1 %123 }
  0xc3   :  { %1501 = vmatpush.lsf.msk.msk.msrb.mxu1 %vm228_vm10, %v1565_v10  ;;  %1460 = vmatpush.msra.mxu3 %v1777_v48 }
  0xc5   :  { %556 = vmatpush.msra.mxu1 %v1798_v59  ;;  %1462 = vmatpush.msra.mxu3 %v1766_v42 }
  0xc7   :  { %1502 = vmatpush.lsf.msk.msk.msrb.mxu1 %vm227_vm11, %v1565_v10  ;;  %1464 = vmatpush.msra.mxu3 %v1755_v36 }
  0xc8   :  { %v362_v40 = vpop.f32.mrf.mxu0  ;;  %1363 = vmatmul.msk.f32.vlgmr.msra.gmra.mxu3 %vm383_vm4, %v1297_v27 }
  0xc9   :  { %557 = vmatpush.msra.mxu1 %v1792_v55  ;;  %446 = vmatpush.msra.mxu2 %v362_v40  ;;  %v1996_v53 = vpop.permute.xlu1 %90 }
  0xcb   :  { %1503 = vmatpush.lsf.msk.msk.msrb.mxu1 %vm226_vm12, %v1565_v10  ;;  %447 = vmatpush.msra.mxu2 %v359_v21 }
  0xcc   :  { %1341 = vmatmul.msk.f32.vlgmr.msra.gmra.mxu2 %vm383_vm4, %v1307_v43 }
  0xcd   :  { %558 = vmatpush.msra.mxu1 %v1777_v48  ;;  %1449 = vmatpush.msrb.mxu2 %v336_v18 }
  0xcf   :  { %1504 = vmatpush.lsf.msk.msk.msrb.mxu1 %vm225_vm13, %v1565_v10  ;;  %1451 = vmatpush.msrb.mxu2 %v1839_v12  ;;  %v1313_v12 = vsel %vm227_vm11, 1.0, %v1566_v26  ;;  %vm139_vm11 = vcmp.eq.s32.totalorder %v1812_v3, %v1931_v25 }
  0xd0   :  { %1364 = vmatmul.msk.f32.gmra.mxu3 %vm383_vm4, %v1298_v46  ;;  %v1305_v25 = vsel %vm139_vm11, 1.0, %v1566_v26  ;;  %v1315_v46 = vsel %vm229_vm9, 1.0, %v1566_v26  ;;  %vm2327_vm9 = vcmp.eq.s32.totalorder %v1812_v3, %v1818_v7 }
  0xd1   :  { %559 = vmatpush.msra.mxu1 %v1766_v42  ;;  %1453 = vmatpush.msrb.mxu2 %v1814_v4  ;;  %v980_v4 = vpop.permute.xlu2 %979 }
  0xd2   :  { %vm1000_vm13 = vcmp.eq.s32.totalorder %v1812_v3, %v980_v4 }
  0xd3   :  { %1505 = vmatpush.lsf.msk.msk.msrb.mxu1 %vm224_vm15, %v1565_v10  ;;  %1455 = vmatpush.msrb.mxu2 %v1798_v59  ;;  %v1309_v59 = vsel %vm223_vm3, 1.0, %v1566_v26  ;;  %v1408_v28 = vsel %vm1000_vm13, 1.0, %v1566_v26 }
  0xd4   :  { %1342 = vmatmul.msk.f32.gmra.mxu2 %vm383_vm4, %v1308_v50 }
  0xd5   :  { %560 = vmatpush.msra.mxu1 %v1755_v36  ;;  %1457 = vmatpush.msrb.mxu2 %v1792_v55  ;;  %v2019_v55 = vpop.permute.xlu1 %93 }
  0xd6   :  { %1357 = vmatmul.msk.f32.vlgmr.msra.gmra.mxu1 %vm383_vm4, %v1291_v31 }
  0xd7   :  { %1506 = vmatpush.lsf.msk.msk.msrb.mxu1 %vm223_vm3, %v1565_v10  ;;  %1459 = vmatpush.msrb.mxu2 %v1777_v48  ;;  %v32_v48 = vld [vmem:[%s2316_s1 + $0x28] sm:$0xff]  ;;  %vm135_vm3 = vcmp.eq.s32.totalorder %v1812_v3, %v1800_v61 }
  0xd8   :  { %1379 = vmatmul.msk.f32.gmra.mxu0 %vm269_vm1, %v32_v48  ;;  %v1301_v60 = vsel %vm135_vm3, 1.0, %v1566_v26  ;;  %v1319_v48 = vsel %vm2324_vm7, 1.0, %v1566_v26 }
  0xd9   :  { %1507 = vmatpush.lsf.msk.msk.msrb.mxu1 %vm222_vm14, %v1565_v10  ;;  %1461 = vmatpush.msrb.mxu2 %v1766_v42  ;;  %vm134_vm14 = vcmp.eq.s32.totalorder %v1812_v3, %v1794_v57  ;;  %v1294_v42 = vsel %vm128_vm0, 1.0, %v1566_v26  ;;  %v33_v57 = vld [vmem:[%s2316_s1 + $0x30] sm:$0xff]  ;;  %v989_v21 = vpop.permute.xlu2 %988 }
  0xda   :  { %v1300_v32 = vsel %vm134_vm14, 1.0, %v1566_v26  ;;  %vm1003_vm3 = vcmp.eq.s32.totalorder %v1812_v3, %v989_v21 }
  0xdb   :  { %1508 = vmatpush.lsf.msk.msk.msrb.mxu1 %vm221_vm2, %v1565_v10  ;;  %vm133_vm2 = vcmp.eq.s32.totalorder %v1812_v3, %v1749_v33  ;;  %v1293_v33 = vsel %vm127_vm6, 1.0, %v1566_v26  ;;  %1463 = vmatpush.msrb.mxu2 %v1755_v36  ;;  %v1310_v36 = vsel %vm224_vm15, 1.0, %v1566_v26  ;;  %vm136_vm15 = vcmp.eq.s32.totalorder %v1812_v3, %v1802_v62  ;;  %v35_v10 = vld [vmem:[%s2316_s1 + $0x40] sm:$0xff] }
  0xdc   :  { %v1299_v56 = vsel %vm133_vm2, 1.0, %v1566_v26  ;;  %1343 = vmatmul.msk.f32.gmra.mxu2 %vm383_vm4, %v1309_v59  ;;  %v1302_v2 = vsel %vm136_vm15, 1.0, %v1566_v26  ;;  %vm137_vm6 = vcmp.eq.s32.totalorder %v1812_v3, %v1782_v51  ;;  %v1312_v62 = vsel %vm226_vm12, 1.0, %v1566_v26  ;;  %v983_v51 = vpop.permute.xlu0 %982 }
  0xdd   :  { %1484 = vllmr.8.mxu1  ;;  %1365 = vmatmul.msk.f32.gmra.mxu3 %vm383_vm4, %v1299_v56  ;;  %v977_v0 = vpop.permute.xlu1 %976  ;;  %v1303_v11 = vsel %vm137_vm6, 1.0, %v1566_v26  ;;  %vm1001_vm14 = vcmp.eq.s32.totalorder %v1812_v3, %v983_v51  ;;  %vm138_vm12 = vcmp.eq.s32.totalorder %v1812_v3, %v1796_v58  ;;  %v1411_v24 = vsel %vm1003_vm3, 1.0, %v1566_v26 }
  0xde   :  { %1358 = vmatmul.msk.f32.gmra.mxu1 %vm383_vm4, %v1292_v49  ;;  %vm999_vm2 = vcmp.eq.s32.totalorder %v1812_v3, %v977_v0  ;;  %v1409_v29 = vsel %vm1001_vm14, 1.0, %v1566_v26  ;;  %v1304_v18 = vsel %vm138_vm12, 1.0, %v1566_v26  ;;  %vm140_vm15 = vcmp.eq.s32.totalorder %v1812_v3, %v1975_v30 }
  0xdf   :  { %v1407_v61 = vsel %vm999_vm2, 1.0, %v1566_v26  ;;  %v1306_v56 = vsel %vm140_vm15, 1.0, %v1566_v26  ;;  %v1316_v30 = vsel %vm230_vm8, 1.0, %v1566_v26  ;;  %v1318_v59 = vsel %vm232_vm5, 1.0, %v1566_v26 }
  0xe0   :  { %1380 = vmatmul.msk.f32.gmra.mxu0 %vm269_vm1, %v33_v57  ;;  %1023 = vxpose.xlu0.b32.start [1/8] (short) %v1407_v61, 128  ;;  %v1168_v5 = vadd.f32 %v1408_v28, %v1407_v61  ;;  %vm2325_vm5 = vcmp.eq.s32.totalorder %v1812_v3, %v1820_v9  ;;  %vm2326_vm8 = vcmp.eq.s32.totalorder %v1812_v3, %v1804_v63  ;;  %v1322_v57 = vsel %vm2327_vm9, 1.0, %v1566_v26 }
  0xe1   :  { %v998_v34 = vpop.permute.xlu2 %997  ;;  %v1321_v14 = vsel %vm2326_vm8, 1.0, %v1566_v26  ;;  %vm129_vm6 = vcmp.eq.s32.totalorder %v1812_v3, %v1996_v53  ;;  %vm130_vm14 = vcmp.eq.s32.totalorder %v1812_v3, %v2019_v55  ;;  %vm2328_vm12 = vcmask 1043456  }
  0xe2   :  { %v1169_v15 = vadd.f32 %v1409_v29, %v1168_v5  ;;  %vm1006_vm13 = vcmp.eq.s32.totalorder %v1812_v3, %v998_v34  ;;  %v1295_v63 = vsel %vm129_vm6, 1.0, %v1566_v26  ;;  %v1296_v61 = vsel %vm130_vm14, 1.0, %v1566_v26 }
  0xe3   :  { %v1414_v50 = vsel %vm1006_vm13, 1.0, %v1566_v26 }
  0xe4   :  { %1344 = vmatmul.msk.f32.gmra.mxu2 %vm383_vm4, %v1310_v36  ;;  %v992_v31 = vpop.permute.xlu0 %991 }
  0xe5   :  { %1366 = vmatmul.msk.f32.gmra.mxu3 %vm383_vm4, %v1300_v32  ;;  %v986_v58 = vpop.permute.xlu1 %985  ;;  %vm1004_vm2 = vcmp.eq.s32.totalorder %v1812_v3, %v992_v31  ;;  %v1320_v32 = vsel %vm2325_vm5, 1.0, %v1566_v26 }
  0xe6   :  { %1359 = vmatmul.msk.f32.gmra.mxu1 %vm383_vm4, %v1293_v33  ;;  %vm1002_vm0 = vcmp.eq.s32.totalorder %v1812_v3, %v986_v58  ;;  %v1412_v40 = vsel %vm1004_vm2, 1.0, %v1566_v26  ;;  %v39_v33 = vld [vmem:[%s2316_s1 + $0x60] sm:$0xff] }
  0xe7   :  { %v1410_v20 = vsel %vm1002_vm0, 1.0, %v1566_v26  ;;  %vm848_vm0 = vcmask 261120  }
  0xe8   :  { %1381 = vmatmul.msk.f32.gmra.mxu0 %vm269_vm1, %v34_v1  ;;  %1024 = vxpose.xlu0.b32.cont [2/8] (short) %v1408_v28, 128  ;;  %v1170_v41 = vadd.f32 %v1410_v20, %v1169_v15 }
  0xea   :  { %v1171_v27 = vadd.f32 %v1411_v24, %v1170_v41 }
  0xec   :  { %1345 = vmatmul.msk.f32.gmra.mxu2 %vm383_vm4, %v1311_v35  ;;  %v1172_v43 = vadd.f32 %v1412_v40, %v1171_v27 }
  0xed   :  { %1367 = vmatmul.msk.f32.gmra.mxu3 %vm383_vm4, %v1301_v60  ;;  %v995_v47 = vpop.permute.xlu1 %994 }
  0xee   :  { %1360 = vmatmul.msk.f32.gmra.mxu1 %vm383_vm4, %v1294_v42  ;;  %vm1005_vm10 = vcmp.eq.s32.totalorder %v1812_v3, %v995_v47  ;;  %v2161_v42 = vpop.f32.mrf.mxu0 }
  0xef   :  { %v1413_v45 = vsel %vm1005_vm10, 1.0, %v1566_v26 }
  0xf0   :  { %1382 = vmatmul.msk.f32.gmra.mxu0 %vm269_vm1, %v35_v10  ;;  %1025 = vxpose.xlu0.b32.cont [3/8] (short) %v1409_v29, 128  ;;  %v1173_v49 = vadd.f32 %v1413_v45, %v1172_v43 }
  0xf2   :  { %v2117_v54 = vadd.f32 %v1414_v50, %v1173_v49 }
  0xf4   :  { %1346 = vmatmul.msk.f32.gmra.mxu2 %vm383_vm4, %v1312_v62 }
  0xf5   :  { %1368 = vmatmul.msk.f32.gmra.mxu3 %vm383_vm4, %v1302_v2 }
  0xf6   :  { %v2168_v36 = vpop.f32.mrf.mxu0 }
  0xf8   :  { %1383 = vmatmul.msk.f32.gmra.mxu0 %vm269_vm1, %v36_v16  ;;  %1026 = vxpose.xlu0.b32.cont [4/8] (short) %v1410_v20, 128 }
  0xfc   :  { %1347 = vmatmul.msk.f32.gmra.mxu2 %vm383_vm4, %v1313_v12 }
  0xfd   :  { %1369 = vmatmul.msk.f32.gmra.mxu3 %vm383_vm4, %v1303_v11 }
  0xfe   :  { %v684_v9 = vpop.f32.mrf.mxu0 }
 0x100   :  { %1384 = vmatmul.msk.f32.gmra.mxu0 %vm269_vm1, %v37_v37  ;;  %1027 = vxpose.xlu0.b32.cont [5/8] (short) %v1411_v24, 128 }
 0x104   :  { %1348 = vmatmul.msk.f32.gmra.mxu2 %vm383_vm4, %v1314_v23 }
 0x105   :  { %1370 = vmatmul.msk.f32.gmra.mxu3 %vm383_vm4, %v1304_v18 }
 0x106   :  { %v687_v35 = vpop.f32.mrf.mxu0 }
 0x108   :  { %1385 = vmatmul.msk.f32.gmra.mxu0 %vm269_vm1, %v38_v52  ;;  %1028 = vxpose.xlu0.b32.cont [6/8] (short) %v1412_v40, 128 }
 0x10c   :  { %1349 = vmatmul.msk.f32.gmra.mxu2 %vm383_vm4, %v1315_v46 }
 0x10d   :  { %1371 = vmatmul.msk.f32.gmra.mxu3 %vm383_vm4, %v1305_v25 }
 0x10e   :  { %v2192_v2 = vpop.f32.mrf.mxu0 }
 0x110   :  { %1386 = vmatmul.msk.f32.gmra.mxu0 %vm269_vm1, %v39_v33  ;;  %1029 = vxpose.xlu0.b32.cont [7/8] (short) %v1413_v45, 128 }
 0x114   :  { %1350 = vmatmul.msk.f32.gmra.mxu2 %vm383_vm4, %v1316_v30 }
 0x115   :  { %1372 = vmatmul.msk.f32.gmra.mxu3 %vm383_vm4, %v1306_v56 }
 0x118   :  { %1387 = vmatmul.msk.f32.gmra.mxu0 %vm269_vm1, %v40_v38  ;;  %1030 = vxpose.xlu0.b32.end [8/8] (short) %v1414_v50, 128 }
 0x11c   :  { %1351 = vmatmul.msk.f32.gmra.mxu2 %vm383_vm4, %v1317_v39 }
 0x120   :  { %1388 = vmatmul.msk.f32.gmra.mxu0 %vm269_vm1, %v41_v44 }
 0x124   :  { %1352 = vmatmul.msk.f32.gmra.mxu2 %vm383_vm4, %v1318_v59 }
 0x128   :  { %1389 = vmatmul.msk.f32.gmra.mxu0 %vm269_vm1, %v42_v6 }
 0x12c   :  { %1353 = vmatmul.msk.f32.gmra.mxu2 %vm383_vm4, %v1319_v48 }
 0x134   :  { %1354 = vmatmul.msk.f32.gmra.mxu2 %vm383_vm4, %v1320_v32 }
 0x13c   :  { %1355 = vmatmul.msk.f32.gmra.mxu2 %vm383_vm4, %v1321_v14 }
 0x144   :  { %1356 = vmatmul.msk.f32.gmra.mxu2 %vm383_vm4, %v1322_v57 }
 0x14b   :  { %v580_v51 = vpop.f32.mrf.mxu3 }
 0x14c   :  { %1361 = vmatmul.msk.f32.vlgmr.msrb.gmra.mxu2 %vm383_vm4, %v1295_v63 }
 0x14f   :  { %v2182_v0 = vpop.f32.mrf.mxu2 }
 0x153   :  { %v2176_v60 = vpop.f32.mrf.mxu1  ;;  %v583_v12 = vpop.f32.mrf.mxu3 }
 0x154   :  { %1362 = vmatmul.msk.f32.gmra.mxu2 %vm383_vm4, %v1296_v61 }
 0x155   :  { %v2196_v5 = vpop.f32.mrf.mxu0 }
 0x157   :  { %v2190_v1 = vpop.f32.mrf.mxu2 }
 0x15b   :  { %v2186_v7 = vpop.f32.mrf.mxu1 }
 0x15d   :  { %v696_v26 = vpop.f32.mrf.mxu0 }
 0x15f   :  { %v455_v4 = vpop.f32.mrf.mxu2 }
 0x160   :  { %v586_v20 = vpop.f32.mrf.mxu3 }
 0x163   :  { %v568_v53 = vpop.f32.mrf.mxu1 }
 0x164   :  { %v569_v28 = vadd.f32 %v568_v53, %v455_v4  ;;  %v1530_v4 = vld [vmem:[%s2317_s2 + $0x18] ss:$0 sm:$0xff] }
 0x165   :  { %v699_v16 = vpop.f32.mrf.mxu0 }
 0x166   :  { %v2194_v62 = vadd.f32 %v684_v9, %v569_v28 }
 0x167   :  { %v458_v11 = vpop.f32.mrf.mxu2 }
 0x168   :  { %v589_v31 = vpop.f32.mrf.mxu3 }
 0x16b   :  { %v571_v10 = vpop.f32.mrf.mxu1 }
 0x16c   :  { %v572_v3 = vadd.f32 %v571_v10, %v458_v11 }
 0x16d   :  { %v702_v41 = vpop.f32.mrf.mxu0 }
 0x16e   :  { %v2198_v55 = vadd.f32 %v687_v35, %v572_v3 }
 0x16f   :  { %v2200_v29 = vpop.f32.mrf.mxu2 }
 0x170   :  { %v592_v43 = vpop.f32.mrf.mxu3 }
 0x175   :  { %v705_v37 = vpop.f32.mrf.mxu0 }
 0x177   :  { %v2202_v15 = vpop.f32.mrf.mxu2 }
 0x178   :  { %v595_v49 = vpop.f32.mrf.mxu3 }
 0x17d   :  { %v708_v45 = vpop.f32.mrf.mxu0 }
 0x17f   :  { %v467_v18 = vpop.f32.mrf.mxu2 }
 0x180   :  { %v581_v58 = vadd.f32 %v580_v51, %v467_v18  ;;  %v598_v56 = vpop.f32.mrf.mxu3 }
 0x182   :  { %v2204_v21 = vadd.f32 %v696_v26, %v581_v58 }
 0x185   :  { %v711_v50 = vpop.f32.mrf.mxu0 }
 0x187   :  { %v470_v23 = vpop.f32.mrf.mxu2 }
 0x188   :  { %v584_v24 = vadd.f32 %v583_v12, %v470_v23  ;;  %v601_v39 = vpop.f32.mrf.mxu3 }
 0x18a   :  { %v2206_v27 = vadd.f32 %v699_v16, %v584_v24 }
 0x18d   :  { %v714_v30 = vpop.f32.mrf.mxu0 }
 0x18f   :  { %v473_v25 = vpop.f32.mrf.mxu2 }
 0x190   :  { %v587_v40 = vadd.f32 %v586_v20, %v473_v25  ;;  %v604_v44 = vpop.f32.mrf.mxu3 }
 0x192   :  { %v734_v47 = vadd.f32 %v702_v41, %v587_v40 }
 0x195   :  { %v717_v38 = vpop.f32.mrf.mxu0 }
 0x197   :  { %v476_v46 = vpop.f32.mrf.mxu2 }
 0x198   :  { %v607_v57 = vpop.f32.mrf.mxu3  ;;  %v590_v16 = vadd.f32 %v589_v31, %v476_v46  ;;  %v751_v31 = vadd.f32 %v1530_v4, %v734_v47  ;;  %v566_v47 = vadd.f32 %v2186_v7, %v2190_v1 }
 0x19a   :  { %v735_v40 = vadd.f32 %v705_v37, %v590_v16 }
 0x19d   :  { %v720_v48 = vpop.f32.mrf.mxu0 }
 0x19f   :  { %v479_v34 = vpop.f32.mrf.mxu2 }
 0x1a0   :  { %v593_v3 = vadd.f32 %v592_v43, %v479_v34  ;;  %v752_v43 = vadd.f32 %v1530_v4, %v735_v40 }
 0x1a2   :  { %v736_v23 = vadd.f32 %v708_v45, %v593_v3  ;;  %v768_v37 = vmax.f32 %v752_v43, 0.0 }
 0x1a5   :  { %v723_v63 = vpop.f32.mrf.mxu0 }
 0x1a7   :  { %v482_v52 = vpop.f32.mrf.mxu2 }
 0x1a8   :  { %v596_v28 = vadd.f32 %v595_v49, %v482_v52  ;;  %v753_v49 = vadd.f32 %v1530_v4, %v736_v23 }
 0x1aa   :  { %v737_v18 = vadd.f32 %v711_v50, %v596_v28  ;;  %v769_v46 = vmax.f32 %v753_v49, 0.0  ;;  %v1039_v49 = vpop.trf.xlu0 }
 0x1af   :  { %v485_v33 = vpop.f32.mrf.mxu2 }
 0x1b0   :  { %v599_v35 = vadd.f32 %v598_v56, %v485_v33  ;;  %v754_v56 = vadd.f32 %v1530_v4, %v737_v18 }
 0x1b2   :  { %v738_v51 = vadd.f32 %v714_v30, %v599_v35  ;;  %v770_v34 = vmax.f32 %v754_v56, 0.0 }
 0x1b4   :  { %v755_v24 = vadd.f32 %v1530_v4, %v738_v51 }
 0x1b6   :  { %v771_v52 = vmax.f32 %v755_v24, 0.0 }
 0x1b7   :  { %v488_v59 = vpop.f32.mrf.mxu2 }
 0x1b8   :  { %v602_v14 = vadd.f32 %v601_v39, %v488_v59  ;;  %v750_v39 = vadd.f32 %v1530_v4, %v2206_v27  ;;  %v749_v59 = vadd.f32 %v1530_v4, %v2204_v21  ;;  %v746_v21 = vadd.f32 %v1530_v4, %v2198_v55  ;;  %v1534_v55 = vld [vmem:[%s2316_s1 + $0x80] sm:$0xff] }
 0x1ba   :  { %v739_v10 = vadd.f32 %v717_v38, %v602_v14  ;;  %v765_v27 = vmax.f32 %v749_v59, 0.0 }
 0x1bc   :  { %v756_v58 = vadd.f32 %v1530_v4, %v739_v10 }
 0x1be   :  { %v772_v33 = vmax.f32 %v756_v58, 0.0 }
 0x1bf   :  { %v491_v6 = vpop.f32.mrf.mxu2 }
 0x1c0   :  { %v605_v32 = vadd.f32 %v604_v44, %v491_v6  ;;  %v767_v44 = vmax.f32 %v751_v31, 0.0  ;;  %v766_v6 = vmax.f32 %v750_v39, 0.0 }
 0x1c2   :  { %v740_v61 = vadd.f32 %v720_v48, %v605_v32 }
 0x1c4   :  { %v757_v26 = vadd.f32 %v1530_v4, %v740_v61  ;;  %v21_v61 = vld [vmem:[%s2317_s2 + $0x30] sm:$0xff] }
 0x1c6   :  { %v773_v25 = vmax.f32 %v757_v26, 0.0 }
 0x1c7   :  { %v494_v9 = vpop.f32.mrf.mxu2 }
 0x1c8   :  { %v608_v53 = vadd.f32 %v607_v57, %v494_v9  ;;  %v745_v57 = vadd.f32 %v1530_v4, %v2194_v62  ;;  %v762_v9 = vmax.f32 %v746_v21, 0.0  ;;  %v22_v62 = vld [vmem:[%s2317_s2 + $0x38] sm:$0xff] }
 0x1ca   :  { %v741_v11 = vadd.f32 %v723_v63, %v608_v53  ;;  %v1535_v53 = vld [vmem:[%s2316_s1 + $0x90] sm:$0xff] }
 0x1cc   :  { %v758_v12 = vadd.f32 %v1530_v4, %v741_v11 }
 0x1ce   :  { %v774_v20 = vmax.f32 %v758_v12, 0.0 }
 0x1cf   :  { %v574_v41 = vpop.f32.mrf.mxu2 }
 0x1d0   :  { %807 = vmatpush.msra.mxu1 %v774_v20  ;;  %v575_v50 = vadd.f32 %v574_v41, %v2200_v29 }
 0x1d2   :  { %808 = vmatpush.msra.mxu1 %v773_v25  ;;  %v730_v48 = vadd.f32 %v2192_v2, %v575_v50 }
 0x1d4   :  { %809 = vmatpush.msra.mxu1 %v772_v33  ;;  %v747_v32 = vadd.f32 %v1530_v4, %v730_v48 }
 0x1d6   :  { %810 = vmatpush.msra.mxu1 %v771_v52  ;;  %v763_v7 = vmax.f32 %v747_v32, 0.0 }
 0x1d7   :  { %v577_v30 = vpop.f32.mrf.mxu2 }
 0x1d8   :  { %v578_v45 = vadd.f32 %v577_v30, %v2202_v15  ;;  %811 = vmatpush.msra.mxu1 %v770_v34  ;;  %v563_v15 = vadd.f32 %v2176_v60, %v2182_v0  ;;  %v761_v60 = vmax.f32 %v745_v57, 0.0  ;;  %v1040_v30 = vpop.trf.xlu0 }
 0x1da   :  { %v731_v38 = vadd.f32 %v2196_v5, %v578_v45  ;;  %812 = vmatpush.msra.mxu1 %v769_v46  ;;  %v727_v5 = vadd.f32 %v2168_v36, %v566_v47  ;;  %v726_v2 = vadd.f32 %v2161_v42, %v563_v15  ;;  %v23_v42 = vld [vmem:[%s2317_s2 + $0x40] sm:$0xff]  ;;  %v1531_v45 = vld [vmem:[%s2317_s2 + $0x48] ss:$0 sm:$0xff] }
 0x1db   :  { %v19_v36 = vld [vmem:[%s2317_s2 + $0x20] sm:$0xf] }
 0x1dc   :  { %813 = vmatpush.msra.mxu1 %v768_v37  ;;  %v748_v29 = vadd.f32 %v1530_v4, %v731_v38  ;;  %v744_v1 = vadd.f32 %v1530_v4, %v727_v5  ;;  %v743_v63 = vadd.f32 %v1530_v4, %v726_v2  ;;  %1398 = vmatpush.msk.msra.mxu2 %vm2328_vm12, %v19_v36  ;;  %v1536_v4 = vld [vmem:[%s2316_s1 + $0x98] sm:$0xff] }
 0x1dd   :  { %1399 = vmatmul.msk.f32.vlgmr.msra.gmra.mxu2 %vm269_vm1, %v1534_v55 }
 0x1de   :  { %814 = vmatpush.msra.mxu1 %v767_v44  ;;  %v764_v14 = vmax.f32 %v748_v29, 0.0  ;;  %v760_v0 = vmax.f32 %v744_v1, 0.0  ;;  %v759_v35 = vmax.f32 %v743_v63, 0.0 }
 0x1e0   :  { %815 = vmatpush.msra.mxu1 %v766_v6  ;;  %v1041_v5 = vpop.trf.xlu0 }
 0x1e2   :  { %816 = vmatpush.msra.mxu1 %v765_v27 }
 0x1e4   :  { %817 = vmatpush.msra.mxu1 %v764_v14 }
 0x1e5   :  { %1400 = vmatmul.msk.f32.gmra.mxu2 %vm269_vm1, %v1633_v8  ;;  %v20_v8 = vld [vmem:[%s2317_s2 + $0x28] sm:$0xff] }
 0x1e6   :  { %818 = vmatpush.msra.mxu1 %v763_v7 }
 0x1e8   :  { %819 = vmatpush.msra.mxu1 %v762_v9 }
 0x1ea   :  { %820 = vmatpush.msra.mxu1 %v761_v60  ;;  %v1042_v60 = vpop.trf.xlu0 }
 0x1ec   :  { %821 = vmatpush.msra.mxu1 %v760_v0 }
 0x1ed   :  { %1401 = vmatmul.msk.f32.gmra.mxu2 %vm269_vm1, %v1535_v53 }
 0x1ee   :  { %822 = vmatpush.msra.mxu1 %v759_v35 }
 0x1ef   :  { %1485 = vmatmul.lmr.bf16.vlgmr.msra.gmra.8.mxu1 }
 0x1f0   :  { %885 = vmatpush.msra.mxu1 %v23_v42 }
 0x1f2   :  { %886 = vmatpush.msra.mxu1 %v22_v62  ;;  %v1043_v0 = vpop.trf.xlu0 }
 0x1f4   :  { %887 = vmatpush.msra.mxu1 %v21_v61 }
 0x1f5   :  { %1402 = vmatmul.msk.f32.gmra.mxu2 %vm269_vm1, %v1536_v4 }
 0x1f6   :  { %888 = vmatpush.msra.mxu1 %v20_v8 }
 0x1f7   :  { %1486 = vmatmul.lmr.bf16.gmra.8.mxu1 }
 0x1fa   :  { %v1044_v35 = vpop.trf.xlu0 }
 0x1fd   :  { %1403 = vmatmul.msk.f32.gmra.mxu2 %vm269_vm1, %v1659_v13 }
 0x1ff   :  { %1487 = vmatmul.lmr.bf16.gmra.8.mxu1 }
 0x202   :  { %v1045_v42 = vpop.trf.xlu0 }
 0x205   :  { %1404 = vmatmul.msk.f32.gmra.mxu2 %vm269_vm1, %v1673_v17 }
 0x207   :  { %1488 = vmatmul.lmr.bf16.gmra.8.mxu1 }
 0x20a   :  { %v1046_v36 = vpop.trf.xlu0 }
 0x20d   :  { %1405 = vmatmul.msk.f32.gmra.mxu2 %vm269_vm1, %v1684_v19 }
 0x20f   :  { %1489 = vmatmul.lmr.bf16.gmra.8.mxu1 }
 0x212   :  { %v1047_v62 = vpop.trf.xlu0 }
 0x215   :  { %1406 = vmatmul.msk.f32.gmra.mxu2 %vm269_vm1, %v1701_v22 }
 0x217   :  { %1490 = vmatmul.lmr.bf16.gmra.8.mxu1 }
 0x21a   :  { %v1048_v55 = vpop.trf.xlu0 }
 0x21f   :  { %1491 = vmatmul.lmr.bf16.gmra.8.mxu1 }
 0x222   :  { %v1049_v61 = vpop.trf.xlu0 }
 0x227   :  { %1492 = vmatmul.lmr.bf16.gmra.8.mxu1 }
 0x22a   :  { %v1050_v53 = vpop.trf.xlu0 }
 0x232   :  { %v1051_v4 = vpop.trf.xlu0 }
 0x23a   :  { %v1052_v8 = vpop.trf.xlu0 }
 0x260   :  { %v934_v51 = vpop.f32.mrf.mxu2 }
 0x268   :  { %v937_v26 = vpop.f32.mrf.mxu2 }
 0x26c   :  { %v824_v28 = vpop.f32.mrf.mxu1 }
 0x26d   :  { %1390 = vmatmul.msk.f32.vlgmr.msra.gmra.mxu1 %vm848_vm0, %v824_v28  ;;  %v1053_v28 = vpop.trf.xlu0 }
 0x270   :  { %v940_v18 = vpop.f32.mrf.mxu2 }
 0x274   :  { %v827_v10 = vpop.f32.mrf.mxu1 }
 0x275   :  { %1391 = vmatmul.msk.f32.gmra.mxu1 %vm848_vm0, %v827_v10  ;;  %v1054_v10 = vpop.trf.xlu0 }
 0x278   :  { %v943_v20 = vpop.f32.mrf.mxu2 }
 0x27c   :  { %v830_v13 = vpop.f32.mrf.mxu1 }
 0x27d   :  { %1392 = vmatmul.msk.f32.gmra.mxu1 %vm848_vm0, %v830_v13 }
 0x280   :  { %v946_v24 = vpop.f32.mrf.mxu2 }
 0x284   :  { %v833_v17 = vpop.f32.mrf.mxu1 }
 0x285   :  { %1393 = vmatmul.msk.f32.gmra.mxu1 %vm848_vm0, %v833_v17 }
 0x288   :  { %v949_v40 = vpop.f32.mrf.mxu2 }
 0x28c   :  { %v836_v19 = vpop.f32.mrf.mxu1 }
 0x28d   :  { %1394 = vmatmul.msk.f32.gmra.mxu1 %vm848_vm0, %v836_v19 }
 0x290   :  { %v952_v33 = vpop.f32.mrf.mxu2 }
 0x294   :  { %v839_v22 = vpop.f32.mrf.mxu1 }
 0x295   :  { %1395 = vmatmul.msk.f32.gmra.mxu1 %vm848_vm0, %v839_v22 }
 0x298   :  { %v955_v43 = vpop.f32.mrf.mxu2 }
 0x29c   :  { %v842_v11 = vpop.f32.mrf.mxu1 }
 0x29d   :  { %1396 = vmatmul.msk.f32.gmra.mxu1 %vm848_vm0, %v842_v11 }
 0x2a4   :  { %v845_v3 = vpop.f32.mrf.mxu1 }
 0x2a5   :  { %1397 = vmatmul.msk.f32.gmra.mxu1 %vm848_vm0, %v845_v3 }
 0x2ea   :  { %v890_v12 = vpop.f32.mrf.mxu1 }
 0x2eb   :  { %v935_v16 = vadd.f32 %v934_v51, %v890_v12 }
 0x2ed   :  { %v959_v1 = vadd.f32 %v1531_v45, %v935_v16 }
 0x2ef   :  { %v967_v63 = vmax.f32 %v959_v1, 0.0 }
 0x2f2   :  { %v893_v58 = vpop.f32.mrf.mxu1 }
 0x2f3   :  { %v938_v15 = vadd.f32 %v937_v26, %v893_v58 }
 0x2f5   :  { %v960_v57 = vadd.f32 %v1531_v45, %v938_v15 }
 0x2f7   :  { %v968_v9 = vmax.f32 %v960_v57, 0.0 }
 0x2fa   :  { %v896_v41 = vpop.f32.mrf.mxu1 }
 0x2fb   :  { %v941_v47 = vadd.f32 %v940_v18, %v896_v41 }
 0x2fd   :  { %v961_v14 = vadd.f32 %v1531_v45, %v941_v47  ;;  %v1271_v47 = vpop.permute.xlu1 %1270 }
 0x2ff   :  { %v969_v7 = vmax.f32 %v961_v14, 0.0 }
 0x302   :  { %v899_v23 = vpop.f32.mrf.mxu1 }
 0x303   :  { %v944_v59 = vadd.f32 %v943_v20, %v899_v23 }
 0x305   :  { %v962_v32 = vadd.f32 %v1531_v45, %v944_v59 }
 0x307   :  { %v970_v2 = vmax.f32 %v962_v32, 0.0 }
 0x30a   :  { %v902_v25 = vpop.f32.mrf.mxu1 }
 0x30b   :  { %v947_v39 = vadd.f32 %v946_v24, %v902_v25  ;;  %v25_v25 = vld [vmem:[%s2317_s2 + $0x50] sm:$0x1]  ;;  %s1567_s2 = smov [#allocation2]  }
 0x30c   :  { %s1280_s27 = sshll.u32 %s1567_s2, 4  ;;  %s1281_s27 = int_to_ptr.vmem [resolvable:$true] %s1280_s27 }
 0x30d   :  { %v963_v29 = vadd.f32 %v1531_v45, %v947_v39 }
 0x30f   :  { %v971_v21 = vmax.f32 %v963_v29, 0.0 }
 0x312   :  { %v905_v56 = vpop.f32.mrf.mxu1 }
 0x313   :  { %v950_v46 = vadd.f32 %v949_v40, %v905_v56  ;;  %v1175_v40 = vrot.slane %v2117_v54, 4 }
 0x315   :  { %v964_v48 = vadd.f32 %v1531_v45, %v950_v46  ;;  %v1176_v56 = vadd.f32 %v1175_v40, %v2117_v54 }
 0x317   :  { %v972_v27 = vmax.f32 %v964_v48, 0.0 }
 0x31a   :  { %v908_v52 = vpop.f32.mrf.mxu1 }
 0x31b   :  { %v953_v34 = vadd.f32 %v952_v33, %v908_v52  ;;  %v1177_v33 = vrot.slane %v1176_v56, 2 }
 0x31d   :  { %v965_v38 = vadd.f32 %v1531_v45, %v953_v34 }
 0x31f   :  { %v973_v6 = vmax.f32 %v965_v38, 0.0 }
 0x322   :  { %v911_v31 = vpop.f32.mrf.mxu1 }
 0x323   :  { %v956_v50 = vadd.f32 %v955_v43, %v911_v31 }
 0x325   :  { %v966_v37 = vadd.f32 %v1531_v45, %v956_v50 }
 0x327   :  { %v974_v44 = vmax.f32 %v966_v37, 0.0 }
 0x329   :  { %1111 = vmatpush.msrb.mxu3 %v974_v44 }
 0x32b   :  { %1112 = vmatpush.msrb.mxu3 %v973_v6 }
 0x32d   :  { %1113 = vmatpush.msrb.mxu3 %v972_v27 }
 0x32f   :  { %1114 = vmatpush.msrb.mxu3 %v971_v21 }
 0x331   :  { %1115 = vmatpush.msrb.mxu3 %v970_v2 }
 0x333   :  { %1116 = vmatpush.msrb.mxu3 %v969_v7 }
 0x335   :  { %1117 = vmatpush.msrb.mxu3 %v968_v9 }
 0x337   :  { %1118 = vmatpush.msrb.mxu3 %v967_v63 }
 0x338   :  { %1415 = vmatmul.msk.f32.vlgmr.msrb.gmra.mxu3 %vm383_vm4, %v1039_v49  ;;  %v1178_v49 = vadd.f32 %v1177_v33, %v1176_v56 }
 0x33a   :  { %v1179_v52 = vrot.slane %v1178_v49, 1 }
 0x33c   :  { %v1180_v43 = vadd.f32 %v1179_v52, %v1178_v49 }
 0x33e   :  { %v1181_v34 = vmax.f32 %v1180_v43, 1.0 }
 0x340   :  { %1416 = vmatmul.msk.f32.gmra.mxu3 %vm383_vm4, %v1040_v30  ;;  %1532 = vrcp.f32 %v1181_v34  ;;  %vm1258_vm1 = vweird.f32 %v1181_v34  ;;  %v1264_v45 = vand.u32 2147483648, %v1181_v34  ;;  %v1262_v37 = vand.u32 2147483647, %v1181_v34 }
 0x342   :  { %v1265_v38 = vor.u32 1.1754944e-38, %v1264_v45  ;;  %vm1263_vm3 = vcmp.eq.f32.partialorder %v1262_v37, 8.507059e+37 }
 0x346   :  { %v1533_v30 = vpop.eup %1532 }
 0x347   :  { %v1254_v31 = vmul.f32 %v1533_v30, %v1181_v34 }
 0x348   :  { %1417 = vmatmul.msk.f32.gmra.mxu3 %vm383_vm4, %v1041_v5 }
 0x349   :  { %v1255_v46 = vsub.f32 1.0, %v1254_v31 }
 0x34b   :  { %v1256_v50 = vmul.f32 %v1533_v30, %v1255_v46 }
 0x34d   :  { %v1257_v39 = vadd.f32 %v1533_v30, %v1256_v50 }
 0x350   :  { %1418 = vmatmul.msk.f32.gmra.mxu3 %vm383_vm4, %v1042_v60 }
 0x358   :  { %1419 = vmatmul.msk.f32.gmra.mxu3 %vm383_vm4, %v1043_v0 }
 0x360   :  { %1420 = vmatmul.msk.f32.gmra.mxu3 %vm383_vm4, %v1044_v35 }
 0x368   :  { %1421 = vmatmul.msk.f32.gmra.mxu3 %vm383_vm4, %v1045_v42 }
 0x370   :  { %1422 = vmatmul.msk.f32.gmra.mxu3 %vm383_vm4, %v1046_v36 }
 0x378   :  { %1423 = vmatmul.msk.f32.gmra.mxu3 %vm383_vm4, %v1047_v62 }
 0x380   :  { %1424 = vmatmul.msk.f32.gmra.mxu3 %vm383_vm4, %v1048_v55 }
 0x388   :  { %1425 = vmatmul.msk.f32.gmra.mxu3 %vm383_vm4, %v1049_v61 }
 0x390   :  { %1426 = vmatmul.msk.f32.gmra.mxu3 %vm383_vm4, %v1050_v53 }
 0x398   :  { %1427 = vmatmul.msk.f32.gmra.mxu3 %vm383_vm4, %v1051_v4 }
 0x3a0   :  { %1428 = vmatmul.msk.f32.gmra.mxu3 %vm383_vm4, %v1052_v8 }
 0x3a8   :  { %1429 = vmatmul.msk.f32.gmra.mxu3 %vm383_vm4, %v1053_v28 }
 0x3b0   :  { %1430 = vmatmul.msk.f32.gmra.mxu3 %vm383_vm4, %v1054_v10  ;;  %vm1259_vm4 = vweird.f32 %v1533_v30 }
 0x3b1   :  { %vm1260_vm11 = vmor %vm1258_vm1, %vm1259_vm4 }
 0x3b2   :  { %v1261_v59 = vsel %vm1260_vm11, %v1533_v30, %v1257_v39 }
 0x3b3   :  { %v1266_v44 = vsel %vm1263_vm3, %v1265_v38, %v1261_v59 }
 0x3bb   :  { %v1120_v13 = vpop.f32.mrf.mxu3 }
 0x3c3   :  { %v1123_v17 = vpop.f32.mrf.mxu3 }
 0x3cb   :  { %v1126_v19 = vpop.f32.mrf.mxu3 }
 0x3d3   :  { %v1129_v22 = vpop.f32.mrf.mxu3 }
 0x3db   :  { %v1132_v11 = vpop.f32.mrf.mxu3 }
 0x3e3   :  { %v1135_v3 = vpop.f32.mrf.mxu3 }
 0x3eb   :  { %v1138_v51 = vpop.f32.mrf.mxu3 }
 0x3f3   :  { %v1141_v26 = vpop.f32.mrf.mxu3 }
 0x3fb   :  { %v1144_v12 = vpop.f32.mrf.mxu3 }
 0x403   :  { %v1147_v16 = vpop.f32.mrf.mxu3 }
 0x40b   :  { %v1150_v18 = vpop.f32.mrf.mxu3 }
 0x413   :  { %v1153_v58 = vpop.f32.mrf.mxu3 }
 0x41b   :  { %v1156_v20 = vpop.f32.mrf.mxu3 }
 0x423   :  { %v1159_v41 = vpop.f32.mrf.mxu3 }
 0x42b   :  { %v1162_v23 = vpop.f32.mrf.mxu3 }
 0x433   :  { %v1165_v24 = vpop.f32.mrf.mxu3 }
 0x434   :  { %1431 = vmatpush.xpose.msk.msrb.mxu0 %vm848_vm0, %v1165_v24 }
 0x438   :  { %1432 = vmatpush.xpose.msk.msrb.mxu0 %vm848_vm0, %v1162_v23 }
 0x43c   :  { %1433 = vmatpush.xpose.msk.msrb.mxu0 %vm848_vm0, %v1159_v41 }
 0x440   :  { %1434 = vmatpush.xpose.msk.msrb.mxu0 %vm848_vm0, %v1156_v20 }
 0x444   :  { %1435 = vmatpush.xpose.msk.msrb.mxu0 %vm848_vm0, %v1153_v58 }
 0x448   :  { %1436 = vmatpush.xpose.msk.msrb.mxu0 %vm848_vm0, %v1150_v18 }
 0x44c   :  { %1437 = vmatpush.xpose.msk.msrb.mxu0 %vm848_vm0, %v1147_v16 }
 0x450   :  { %1438 = vmatpush.xpose.msk.msrb.mxu0 %vm848_vm0, %v1144_v12 }
 0x454   :  { %1439 = vmatpush.xpose.msk.msrb.mxu0 %vm848_vm0, %v1141_v26 }
 0x458   :  { %1440 = vmatpush.xpose.msk.msrb.mxu0 %vm848_vm0, %v1138_v51 }
 0x45c   :  { %1441 = vmatpush.xpose.msk.msrb.mxu0 %vm848_vm0, %v1135_v3 }
 0x460   :  { %1442 = vmatpush.xpose.msk.msrb.mxu0 %vm848_vm0, %v1132_v11 }
 0x464   :  { %1443 = vmatpush.xpose.msk.msrb.mxu0 %vm848_vm0, %v1129_v22 }
 0x468   :  { %1444 = vmatpush.xpose.msk.msrb.mxu0 %vm848_vm0, %v1126_v19 }
 0x46c   :  { %1445 = vmatpush.xpose.msk.msrb.mxu0 %vm848_vm0, %v1123_v17 }
 0x470   :  { %1446 = vmatpush.xpose.msk.msrb.mxu0 %vm848_vm0, %v1120_v13 }
 0x473   :  { %1447 = vmatmul.msk.f32.vlgmr.msrb.gmra.mxu0 %vm848_vm0, %v25_v25 }
 0x4f0   :  { %v1250_v54 = vpop.f32.mrf.mxu0 }
 0x4f1   :  { %v1267_v48 = vmul.f32 %v1266_v44, %v1250_v54 }
 0x4f3   :  { %v1273_v6 = vadd.f32 %v1271_v47, %v1267_v48 }
 0x4f5   :  { %1274 = vst [vmem:[#allocation2] sm:$0x1] %v1273_v6 }
 0x4f6   :  { %1285 = dma.vmem_to_hbm [thread:$0]  %s1281_s27, 16, %s1283_s29, [#allocation3]  }
 0x4f7   :  { %1561 = dma.done.wait [#allocation3], 16  }
 0x4f8   :  { %1562 = vsyncadd [#allocation3], 4294967280 }
 0x4f9   :  { %1290 = vsyncpa [#allocation3], 1 }

</bundles_post_ra>
